<compile_context>
chip_gen: v6e
topology: v6e:2x2x1
jax: 0.10.0
libtpu: 0.0.40
codegen_flags: <defaults>
</compile_context>

<pallas_src>
import functools
import math

import jax
import jax.numpy as jnp
from jax.experimental import pallas as pl
from jax.experimental.pallas import tpu as pltpu


def _loglinear_kernel(x_ref, w_ref, b_ref, o_ref, *, d, k, apply_sigmoid):
    # x_ref: (tb, k*d) VMEM       w_ref: (1, k*d) f32 VMEM (resident)
    # b_ref: (1, 1)   f32 SMEM    o_ref: (tb, k) VMEM
    prod = x_ref[...] * w_ref[...]                 # VPU multiply; promotes to f32 (w is f32)
    cols = []
    for j in range(k):                             # k is static and small (<= 16)
        seg = prod[:, j * d:(j + 1) * d]           # contiguous lane slice
        cols.append(jnp.sum(seg, axis=-1, keepdims=True))   # XLU lane reduce
    y = cols[0] if k == 1 else jnp.concatenate(cols, axis=-1)
    y = y + b_ref[0, 0]
    if apply_sigmoid:
        y = jax.nn.sigmoid(y)                      # EUP epilogue (free slot)
    o_ref[...] = y.astype(o_ref.dtype)


def _vmem_plan():
    """Return (per-input-buffer byte target, vmem_limit_bytes), generation aware."""
    cap = 64 << 20                                 # assume the tightest part (v7x: 64 MiB / TC)
    try:
        info = pltpu.get_tpu_info()
        cap = int(getattr(info, "vmem_capacity_bytes", cap)) or cap
    except Exception:
        pass
    vmem_limit = max(32 << 20, min(cap - (16 << 20), 100 << 20))
    # Budget: 2 double-buffered x tiles + f32 product temp + outputs/weight/headroom.
    per_buf = max(1 << 20, min(16 << 20, vmem_limit // 5))
    return per_buf, vmem_limit


def _num_tensorcores():
    """Best-effort guess of TensorCores sharing the 'parallel' grid axis."""
    try:
        kind = jax.devices()[0].device_kind.lower()
    except Exception:
        return 1
    return 2 if any(t in kind for t in ("v4", "v5p", "v7", "tpu7", "7x")) else 1


def _pick_rows(n_rows, width, itemsize, per_buf_bytes, cores):
    """Rows per grid step; VMEM cost uses the lane-padded (…,128) footprint."""
    if n_rows <= 8:
        return n_rows                              # one full-array block
    bytes_per_row = pl.cdiv(width, 128) * 128 * itemsize
    rows = max(8, (per_buf_bytes // bytes_per_row) // 8 * 8)
    rows = min(rows, (n_rows // 8) * 8)
    if cores > 1 and rows >= n_rows and n_rows >= 16:
        rows = pl.cdiv(pl.cdiv(n_rows, cores), 8) * 8
    return max(rows, 8)


def _log_linear_pallas(x, w, b, *, apply_sigmoid):
    B, D = x.shape
    x_isz = jnp.dtype(x.dtype).itemsize

    # Lane packing: put k logical rows side by side along lanes.  k must divide both
    # 128//D (so k*D | 128) and B (so the reshape is a free bitcast and no pad copy).
    k = 1
    if 0 < D < 128 and 128 % D == 0:
        k = max(1, min(math.gcd(128 // D, B), 16))
    n_rows, width = B // k, k * D

    per_buf, vmem_limit = _vmem_plan()
    tb = _pick_rows(n_rows, width, x_isz, per_buf, _num_tensorcores())
    steps = pl.cdiv(n_rows, tb)

    xr = x.reshape(n_rows, width)                        # contiguous: free reshape, no copy
    w_row = jnp.asarray(w, jnp.float32).reshape(1, D)    # keep weights in f32 (tiny, resident)
    w_packed = w_row if k == 1 else jnp.tile(w_row, (1, k))
    b_scalar = jnp.asarray(b, jnp.float32).reshape(1, 1)

    kernel = functools.partial(_loglinear_kernel, d=D, k=k, apply_sigmoid=apply_sigmoid)
    out = pl.pallas_call(
        kernel,
        out_shape=jax.ShapeDtypeStruct((n_rows, k), x.dtype),
        grid_spec=pltpu.PrefetchScalarGridSpec(
            num_scalar_prefetch=0,
            grid=(steps,),
            in_specs=[
                pl.BlockSpec((tb, width), lambda i: (i, 0)),        # streamed x tiles
                pl.BlockSpec((1, width), lambda i: (0, 0)),         # resident f32 weight row
                pl.BlockSpec(memory_space=pltpu.MemorySpace.SMEM),  # bias scalar in SMEM
            ],
            out_specs=pl.BlockSpec((tb, k), lambda i: (i, 0)),
        ),
        compiler_params=pltpu.CompilerParams(
            dimension_semantics=("parallel",),
            vmem_limit_bytes=vmem_limit,
        ),
        cost_estimate=pl.CostEstimate(
            flops=2 * B * D,
            transcendentals=B if apply_sigmoid else 0,
            bytes_accessed=B * D * x_isz + B * x_isz + D * 4 + 4,
        ),
    )(xr, w_packed, b_scalar)
    # (n_rows, k) row-major is exactly the logical rows in order; undo the packing.
    return out.reshape(-1)[:B].reshape(B, 1)


def log_linear_forward(x, w, b):
    """LogLinear.forward: x @ W^T + b (no sigmoid)."""
    return _log_linear_pallas(x, w, b, apply_sigmoid=False)


def log_linear_predict(x, w, b):
    """LogLinear.predict: sigmoid(x @ W^T + b), sigmoid fused into the kernel epilogue."""
    return _log_linear_pallas(x, w, b, apply_sigmoid=True)


def _check_case(key, batch, embedding_dim):
    kx, kw, kb = jax.random.split(key, 3)
    x = jax.random.normal(kx, (batch, embedding_dim), dtype=jnp.float32)
    bound = 1.0 / (embedding_dim ** 0.5)           # nn.Linear default init range
    w = jax.random.uniform(kw, (1, embedding_dim), jnp.float32, -bound, bound)
    b = jax.random.uniform(kb, (1,), jnp.float32, -bound, bound)

    # Elementwise f32 reference (avoids XLA's reduced-precision matmul on TPU).
    ref = jnp.sum(x * w.reshape(1, -1), axis=-1, keepdims=True) + b

    out = jax.block_until_ready(log_linear_forward(x, w, b))
    assert out.shape == (batch, 1)
    assert jnp.allclose(out, ref, atol=1e-4, rtol=1e-4), "forward mismatch vs reference"

    pred = jax.block_until_ready(log_linear_predict(x, w, b))
    assert jnp.allclose(pred, jax.nn.sigmoid(ref), atol=1e-4, rtol=1e-4), "predict mismatch"


if __name__ == "__main__":
    key = jax.random.PRNGKey(0)
    k0, k1, k2 = jax.random.split(key, 3)
    _check_case(k0, batch=16, embedding_dim=32)     # packed (k=4), single block
    _check_case(k1, batch=13, embedding_dim=40)     # unpacked, ragged last block
    _check_case(k2, batch=100, embedding_dim=32)    # packed, multi-step ragged grid
    print("KERNEL_OK")
</pallas_src>

<mosaic_0001>
module attributes {stable_mosaic.version = 11 : i64} {
  func.func @_loglinear_kernel(%arg0: i32, %arg1: memref<4x128xf32, #tpu.memory_space<vmem>>, %arg2: memref<1x128xf32, #tpu.memory_space<vmem>>, %arg3: memref<1x1xf32, #tpu.memory_space<smem>>, %arg4: memref<4x4xf32, #tpu.memory_space<vmem>>) attributes {dimension_semantics = [#tpu.dimension_semantics<parallel>], iteration_bounds = array<i64: 1>, scalar_prefetch = 0 : i64, scratch_operands = 0 : i64, tpu.core_type = #tpu.core_type<tc>, window_params = [{transform_indices = @transform_0, window_bounds = array<i64: 4, 128>}, {pipeline_mode = #tpu.pipeline_mode<synchronous>, transform_indices = @transform_1, window_bounds = array<i64: 1, 128>}, {transform_indices = @transform_2, window_bounds = array<i64: 1, 1>}, {transform_indices = @transform_3, window_bounds = array<i64: 4, 4>}]} {
    %c0 = arith.constant 0 : index
    %c0_0 = arith.constant 0 : index
    %0 = vector.load %arg1[%c0, %c0_0] : memref<4x128xf32, #tpu.memory_space<vmem>>, vector<4x128xf32>
    %c0_1 = arith.constant 0 : index
    %c0_2 = arith.constant 0 : index
    %1 = vector.load %arg2[%c0_1, %c0_2] : memref<1x128xf32, #tpu.memory_space<vmem>>, vector<1x128xf32>
    %2 = vector.broadcast %1 : vector<1x128xf32> to vector<4x128xf32>
    %3 = arith.mulf %0, %2 : vector<4x128xf32>
    %4 = vector.extract_strided_slice %3 {offsets = [0, 0], sizes = [4, 32], strides = [1, 1]} : vector<4x128xf32> to vector<4x32xf32>
    %cst = arith.constant dense<0.000000e+00> : vector<4xf32>
    %5 = vector.multi_reduction <add>, %4, %cst [1] : vector<4x32xf32> to vector<4xf32>
    %6 = vector.shape_cast %5 : vector<4xf32> to vector<4x1xf32>
    %7 = vector.extract_strided_slice %3 {offsets = [0, 32], sizes = [4, 32], strides = [1, 1]} : vector<4x128xf32> to vector<4x32xf32>
    %cst_3 = arith.constant dense<0.000000e+00> : vector<4xf32>
    %8 = vector.multi_reduction <add>, %7, %cst_3 [1] : vector<4x32xf32> to vector<4xf32>
    %9 = vector.shape_cast %8 : vector<4xf32> to vector<4x1xf32>
    %10 = vector.extract_strided_slice %3 {offsets = [0, 64], sizes = [4, 32], strides = [1, 1]} : vector<4x128xf32> to vector<4x32xf32>
    %cst_4 = arith.constant dense<0.000000e+00> : vector<4xf32>
    %11 = vector.multi_reduction <add>, %10, %cst_4 [1] : vector<4x32xf32> to vector<4xf32>
    %12 = vector.shape_cast %11 : vector<4xf32> to vector<4x1xf32>
    %13 = vector.extract_strided_slice %3 {offsets = [0, 96], sizes = [4, 32], strides = [1, 1]} : vector<4x128xf32> to vector<4x32xf32>
    %cst_5 = arith.constant dense<0.000000e+00> : vector<4xf32>
    %14 = vector.multi_reduction <add>, %13, %cst_5 [1] : vector<4x32xf32> to vector<4xf32>
    %15 = vector.shape_cast %14 : vector<4xf32> to vector<4x1xf32>
    %16 = tpu.concatenate %6, %9, %12, %15 in 1 : vector<4x1xf32>, vector<4x1xf32>, vector<4x1xf32>, vector<4x1xf32> -> vector<4x4xf32>
    %c0_6 = arith.constant 0 : index
    %c0_7 = arith.constant 0 : index
    %17 = memref.load %arg3[%c0_6, %c0_7] : memref<1x1xf32, #tpu.memory_space<smem>>
    %18 = vector.broadcast %17 : f32 to vector<4x4xf32>
    %19 = arith.addf %16, %18 : vector<4x4xf32>
    %c0_8 = arith.constant 0 : index
    %c0_9 = arith.constant 0 : index
    %20 = vector.load %arg4[%c0_8, %c0_9] : memref<4x4xf32, #tpu.memory_space<vmem>>, vector<4x4xf32>
    tpu.vector_store %arg4[%c0_8, %c0_9], %19 {strides = array<i32>} : memref<4x4xf32, #tpu.memory_space<vmem>>, vector<4x4xf32>,
    return
  }
  func.func @transform_0(%arg0: i32) -> (i32, i32) {
    %c0_i32 = arith.constant 0 : i32
    %c0_i32_0 = arith.constant 0 : i32
    return %arg0, %c0_i32 : i32, i32
  }
  func.func @transform_1(%arg0: i32) -> (i32, i32) {
    %c0_i32 = arith.constant 0 : i32
    %c0_i32_0 = arith.constant 0 : i32
    %c0_i32_1 = arith.constant 0 : i32
    return %c0_i32, %c0_i32_0 : i32, i32
  }
  func.func @transform_2(%arg0: i32) -> (i32, i32) {
    %c0_i32 = arith.constant 0 : i32
    %c0_i32_0 = arith.constant 0 : i32
    %c0_i32_1 = arith.constant 0 : i32
    return %c0_i32, %c0_i32_0 : i32, i32
  }
  func.func @transform_3(%arg0: i32) -> (i32, i32) {
    %c0_i32 = arith.constant 0 : i32
    %c0_i32_0 = arith.constant 0 : i32
    return %arg0, %c0_i32 : i32, i32
  }
}

</mosaic_0001>

<bundles_post_ra>
// kernel: tpu_custom_call.1
= control target key start
LH: loop header
LB: loop body
LE: loop exit
PB: predicated region body
PF: predicated region fallthrough
CT: control target
= control target key end

     0   :  { %9 = vsyncpa [#allocation4], 0  ;;  %s173_s0 = inlined_call_operand.hbm [shape: f32[4,128], index: 0, kind: input, shape index: {}]   ;;  %s174_s1 = inlined_call_operand.vmem [shape: f32[1,128], index: 1, kind: input, shape index: {}]   ;;  %s175_s2 = inlined_call_operand.<no memory space> [shape: f32[1,1], index: 2, kind: input, shape index: {}]   ;;  %s176_s3 = inlined_call_operand.hbm [shape: f32[4,4], index: 3, kind: output, shape index: {}]  }
   0x1   :  { %10 = vsyncpa [#allocation5], 0  ;;  %s136_s12 = smov [#allocation3]  }
   0x2   :  { %s17_s13 = sshll.u32 %s136_s12, 4  ;;  %s18_s13 = int_to_ptr.vmem [resolvable:$true] %s17_s13 }
   0x3   :  { %s100_s14 = scalar_lea.vmem %s18_s13, 64  ;;  %p105_p1 = scmp.lt.s32.totalorder %s18_s13, %s18_s13 }
   0x4   :  { %p101_p0 = scmp.ne.s32.totalorder %s18_s13, %s100_s14  ;;  %p106_p2 = scmp.lt.s32.totalorder %s100_s14, %s100_s14 }
   0x6   :  { %p107_p3 = por %p106_p2, %p105_p1 }
   0x8   :  { %p108_p4 = pnand %p107_p3, %p101_p0 }
   0xa   :  { %111 = shalt.err (!%p108_p4)
}
   0xb   :  { %20 = dma.hbm_to_vmem [thread:$0]  %s173_s0, 64, %s18_s13, [#allocation4]  }
   0xc   :  { %132 = dma.done.wait [#allocation4], 64  }
   0xd   :  { %133 = vsyncadd [#allocation4], 4294967232  ;;  %v28_v0 = vld [vmem:[#allocation3] sm:$0xf]  ;;  %s137_s19 = smov 96   ;;  %s138_s20 = smov 32   ;;  %v67_v15 = vstv %s175_s2 }
   0xe   :  { %v86_v1 = vld [vmem:[%s174_s1] ss:$0 sm:$0xff]  ;;  %s139_s21 = smov 64   ;;  %vm37_vm0 = vcmask 257024   ;;  %vm60_vm1 = vcmask 7168   ;;  %vm62_vm2 = vcmask 15360  }
   0xf   :  { %v36_v2 = vmul.f32 %v86_v1, %v28_v0  ;;  %vm64_vm3 = vcmask 23552   ;;  %s140_s22 = smov [#allocation6]   ;;  %vm69_vm4 = vcmask 27648  }
  0x10   :  { %s77_s23 = sshll.u32 %s140_s22, 4  ;;  %s78_s23 = int_to_ptr.vmem [resolvable:$true] %s77_s23 }
  0x11   :  { %42 = vrot.lane.b32.xlu0 %v36_v2, %s137_s19  ;;  %54 = vrot.lane.b32.xlu1 %v36_v2, %s138_s20  ;;  %v38_v3 = vsel %vm37_vm0, %v36_v2, 0.0  ;;  %s112_s24 = scalar_lea.vmem %s78_s23, 64  ;;  %p117_p6 = scmp.lt.s32.totalorder %s78_s23, %s78_s23 }
  0x12   :  { %p113_p5 = scmp.ne.s32.totalorder %s78_s23, %s112_s24  ;;  %p118_p7 = scmp.lt.s32.totalorder %s112_s24, %s112_s24 }
  0x14   :  { %p119_p8 = por %p118_p7, %p117_p6 }
  0x15   :  { %48 = vrot.lane.b32.xlu0 %v36_v2, %s139_s21 }
  0x16   :  { %p120_p9 = pnand %p119_p8, %p113_p5 }
  0x35   :  { %39 = vadd.xlane.f32.xlu1 %v38_v3 }
  0x83   :  { %v43_v4 = vpop.permute.xlu0 %42  ;;  %v55_v5 = vpop.permute.xlu1 %54 }
  0x84   :  { %v45_v6 = vsel %vm37_vm0, %v43_v4, 0.0  ;;  %v57_v7 = vsel %vm37_vm0, %v55_v5, 0.0 }
  0x85   :  { %46 = vadd.xlane.f32.xlu0 %v45_v6  ;;  %58 = vadd.xlane.f32.xlu1 %v57_v7 }
  0x87   :  { %v49_v8 = vpop.permute.xlu0 %48 }
  0x88   :  { %v51_v9 = vsel %vm37_vm0, %v49_v8, 0.0 }
  0x89   :  { %52 = vadd.xlane.f32.xlu0 %v51_v9 }
  0xbe   :  { %v40_v10 = vpop.xlane.xlu1 %39 }
 0x10e   :  { %v47_v11 = vpop.xlane.xlu0 %46  ;;  %v59_v12 = vpop.xlane.xlu1 %58 }
 0x10f   :  { %v61_v13 = vsel %vm60_vm1, %v40_v10, %v47_v11 }
 0x112   :  { %v53_v14 = vpop.xlane.xlu0 %52 }
 0x113   :  { %v63_v16 = vsel %vm62_vm2, %v61_v13, %v53_v14 }
 0x114   :  { %v65_v17 = vsel %vm64_vm3, %v63_v16, %v59_v12 }
 0x115   :  { %v68_v18 = vadd.f32 %v67_v15, %v65_v17 }
 0x117   :  { %70 = vst.msk [vmem:[#allocation6] sm:$0xf] %vm69_vm4, %v68_v18 }
 0x118   :  { %123 = shalt.err (!%p120_p9)
}
 0x119   :  { %80 = dma.vmem_to_hbm [thread:$0]  %s78_s23, 64, %s176_s3, [#allocation5]  }
 0x11a   :  { %134 = dma.done.wait [#allocation5], 64  }
 0x11b   :  { %135 = vsyncadd [#allocation5], 4294967232 }
 0x11c   :  { %84 = vsyncpa [#allocation4], 1 }
 0x11d   :  { %85 = vsyncpa [#allocation5], 1 }

</bundles_post_ra>
